<compile_context>
chip_gen: v7x
topology: tpu7x:2x2x1
jax: 0.10.0
libtpu: 0.0.40
codegen_flags: <defaults>
</compile_context>

<pallas_src>
import functools

import jax
import jax.numpy as jnp
from jax.experimental import pallas as pl
from jax.experimental.pallas import tpu as pltpu


def _ensemble_kernel(x_ref, w_ref, b_ref, out_ref, acc_ref, *,
                     models_per_group, d_out, n_models, n_groups):
    """One (batch-tile, model-group) step of the fused ensemble forward.

    x_ref   : (TB, D_in)          shared input tile
    w_ref   : (D_in, G*D_out)     weights of this model group, fused on lanes
    b_ref   : (1, G*D_out)        f32 biases of this model group
    out_ref : (N+1, TB, D_out)    resident across the group axis; mean in slot N
    acc_ref : (TB, D_out) f32     running member sum (for the mean)
    """
    j = pl.program_id(1)

    @pl.when(j == 0)
    def _():
        acc_ref[...] = jnp.zeros_like(acc_ref)

    # One lane-dense MXU matmul covering every member of this group at once.
    y = jnp.dot(x_ref[...], w_ref[...], preferred_element_type=jnp.float32)
    y = y + b_ref[...]                         # bias already f32 (pre-cast)
    y_out = y.astype(out_ref.dtype)            # single cast over the whole slab

    acc = acc_ref[...]
    for g in range(models_per_group):          # static, small unrolled loop
        lo = g * d_out                         # lane-aligned (d_out % 128 == 0)
        # Static member index on the common single-group path; dynamic
        # first-axis index only when the fused-lane axis is actually tiled.
        idx = g if n_groups == 1 else j * models_per_group + g
        out_ref[idx] = y_out[:, lo:lo + d_out]
        acc = acc + y[:, lo:lo + d_out]
    acc_ref[...] = acc

    # combination_type == 'mean'
    # TODO(synk): combination_type='median' is not implemented (mean only).
    @pl.when(j == n_groups - 1)
    def _():
        out_ref[n_models] = (acc_ref[...] * (1.0 / n_models)).astype(out_ref.dtype)


def _choose_batch_tile(batch, sublane):
    """Largest tile that divides `batch`, is a multiple of `sublane`, is
    <= 256 rows, and leaves >= 2 grid steps when the batch allows (so x/out
    DMAs pipeline and the batch axis can shard across TensorCores)."""
    if batch <= sublane:
        return batch
    limit = min(batch // 2, 512)
    candidates = [t for t in range(sublane, limit + 1, sublane) if batch % t == 0]
    if not candidates:
        return batch                     # e.g. ragged batch: full-extent block
    small = [t for t in candidates if t <= 256]
    return max(small) if small else min(candidates)


def _choose_models_per_group(n_models, d_in, d_out, w_bytes,
                             weight_budget_bytes=8 << 20):
    """Largest divisor of n_models whose fused weight tile fits the budget
    (keeps the resident weight comfortable within v7x's 64 MiB VMEM)."""
    per_model = max(d_in * d_out * w_bytes, 1)
    g = int(max(1, min(n_models, weight_budget_bytes // per_model)))
    while n_models % g:
        g -= 1
    return g


@functools.partial(jax.jit, static_argnames=("batch_tile", "models_per_group"))
def ensemble_forward(x, w_fused, biases, *, batch_tile=None, models_per_group=None):
    """x: (B, D_in); w_fused: (D_in, N*D_out); biases: (N, D_out).

    Returns (N + 1, B, D_out): per-model outputs followed by their mean.
    """
    n_models, d_out = biases.shape
    b, d_in = x.shape
    fused = n_models * d_out
    assert w_fused.shape == (d_in, fused)
    # Lane-dense member slices / unmasked stores require a 128-lane boundary.
    assert d_out % 128 == 0, "d_out must be a multiple of 128 lanes (pad if needed)"

    out_dtype = x.dtype
    sublane = 16 if out_dtype == jnp.bfloat16 else 8

    tb = _choose_batch_tile(b, sublane) if batch_tile is None else batch_tile
    assert b % tb == 0, "batch_tile must divide batch"  # TODO(synk): pad ragged batches

    w_bytes = jnp.dtype(w_fused.dtype).itemsize
    g = (_choose_models_per_group(n_models, d_in, d_out, w_bytes)
         if models_per_group is None else models_per_group)
    assert n_models % g == 0, "models_per_group must divide n_models"
    n_groups = n_models // g
    gl = g * d_out                                     # fused lanes per group

    b_fused = biases.reshape(1, fused).astype(jnp.float32)   # pre-cast once

    kernel = functools.partial(_ensemble_kernel, models_per_group=g, d_out=d_out,
                               n_models=n_models, n_groups=n_groups)

    # Grid-invariant weight/bias blocks: single buffer (no wasted 2x VMEM).
    if n_groups == 1:
        w_spec = pl.BlockSpec((d_in, gl), lambda i, j: (0, j),
                              pipeline_mode=pl.Buffered(1))
        b_spec = pl.BlockSpec((1, gl), lambda i, j: (0, j),
                              pipeline_mode=pl.Buffered(1))
        w_bufs = 1
    else:
        w_spec = pl.BlockSpec((d_in, gl), lambda i, j: (0, j))
        b_spec = pl.BlockSpec((1, gl), lambda i, j: (0, j))
        w_bufs = 2

    # Explicit scoped-VMEM budget: weight/bias tiles + double-buffered x/out
    # tiles + f32 accumulator, with headroom.  Capped at v7x physical (64 MiB).
    x_bytes = jnp.dtype(x.dtype).itemsize
    out_bytes = jnp.dtype(out_dtype).itemsize
    need = (w_bufs * d_in * gl * w_bytes
            + w_bufs * gl * 4
            + 2 * tb * d_in * x_bytes
            + 2 * (n_models + 1) * tb * d_out * out_bytes
            + tb * d_out * 4)
    vmem_limit = int(min(max(need * 5 // 4 + (2 << 20), 16 << 20), 64 << 20))

    return pl.pallas_call(
        kernel,
        out_shape=jax.ShapeDtypeStruct((n_models + 1, b, d_out), out_dtype),
        grid_spec=pltpu.PrefetchScalarGridSpec(
            num_scalar_prefetch=0,
            grid=(b // tb, n_groups),                  # batch tiles x model groups
            in_specs=[
                pl.BlockSpec((tb, d_in), lambda i, j: (i, 0)),   # x tile
                w_spec,                                          # fused W group
                b_spec,                                          # fused bias group
            ],
            out_specs=pl.BlockSpec((n_models + 1, tb, d_out),
                                   lambda i, j: (0, i, 0)),      # resident over j
            scratch_shapes=[pltpu.VMEM((tb, d_out), jnp.float32)],
        ),
        compiler_params=pltpu.CompilerParams(
            dimension_semantics=("parallel", "arbitrary"),
            vmem_limit_bytes=vmem_limit,
        ),
    )(x, w_fused, b_fused)


def init_ensemble_params(key, n_models, d_in, d_out, dtype=jnp.float32):
    """Kaiming-uniform per-member weights, stored directly in the fused
    (D_in, N*D_out) layout the kernel consumes (member i's transposed weight
    is w_fused[:, i*D_out:(i+1)*D_out]).  Biases are zeros: init_model's
    kaiming_uniform_ on a 1-D bias raises -> zeros_ fallback.
    """
    bound = jnp.sqrt(6.0 / d_in).astype(dtype)     # fan_in = d_in, a = 0
    w_fused = jax.random.uniform(
        key, (d_in, n_models, d_out), dtype=dtype, minval=-bound, maxval=bound
    ).reshape(d_in, n_models * d_out)
    b = jnp.zeros((n_models, d_out), dtype=dtype)
    return w_fused, b


if __name__ == "__main__":
    N_MODELS = 4
    BATCH = 64          # tiled to 32-row blocks -> grid of 2 batch steps
    D_IN = 32
    D_OUT = 128         # 128-lane aligned member slices

    key = jax.random.PRNGKey(0)
    kx, kw = jax.random.split(key)
    x = jax.random.normal(kx, (BATCH, D_IN), dtype=jnp.float32)
    w_fused, biases = init_ensemble_params(kw, N_MODELS, D_IN, D_OUT)

    out = jax.block_until_ready(ensemble_forward(x, w_fused, biases))

    # Pure-JAX reference of the Ensemble semantics (per-member Linear + mean).
    w_per_model = w_fused.reshape(D_IN, N_MODELS, D_OUT).transpose(1, 0, 2)
    ref_outs = jnp.einsum("bi,nio->nbo", x, w_per_model) + biases[:, None, :]
    ref = jnp.concatenate(
        [ref_outs, jnp.mean(ref_outs, axis=0, keepdims=True)], axis=0
    )
    assert out.shape == (N_MODELS + 1, BATCH, D_OUT)
    assert jnp.allclose(out, ref, atol=1e-5, rtol=1e-5)

    # bf16 path (halves weight HBM traffic/VMEM residency; f32 MXU accumulation).
    out_bf16 = jax.block_until_ready(
        ensemble_forward(x.astype(jnp.bfloat16),
                         w_fused.astype(jnp.bfloat16),
                         biases.astype(jnp.bfloat16)))
    assert out_bf16.shape == (N_MODELS + 1, BATCH, D_OUT)
    assert jnp.allclose(out_bf16.astype(jnp.float32), ref, atol=1e-1, rtol=1e-1)

    # Grouped fused-lane path (the v7x/large-ensemble tiling: 2 model groups,
    # mean accumulated in VMEM scratch across the "arbitrary" group axis).
    out_grp = jax.block_until_ready(
        ensemble_forward(x, w_fused, biases, models_per_group=2))
    assert jnp.allclose(out_grp, ref, atol=1e-5, rtol=1e-5)

    print("KERNEL_OK")
</pallas_src>

<mosaic_0001>
module attributes {stable_mosaic.version = 11 : i64} {
  func.func @_ensemble_kernel(%arg0: i32, %arg1: i32, %arg2: memref<32x32xf32, #tpu.memory_space<vmem>>, %arg3: memref<32x512xf32, #tpu.memory_space<vmem>>, %arg4: memref<1x512xf32, #tpu.memory_space<vmem>>, %arg5: memref<5x32x128xf32, #tpu.memory_space<vmem>>, %arg6: memref<32x128xf32, #tpu.memory_space<vmem>>) attributes {dimension_semantics = [#tpu.dimension_semantics<parallel>, #tpu.dimension_semantics<arbitrary>], iteration_bounds = array<i64: 2, 1>, scalar_prefetch = 0 : i64, scratch_operands = 1 : i64, tpu.core_type = #tpu.core_type<tc>, window_params = [{transform_indices = @transform_0, window_bounds = array<i64: 32, 32>}, {pipeline_mode = #tpu.pipeline_mode<synchronous>, transform_indices = @transform_1, window_bounds = array<i64: 32, 512>}, {pipeline_mode = #tpu.pipeline_mode<synchronous>, transform_indices = @transform_2, window_bounds = array<i64: 1, 512>}, {transform_indices = @transform_3, window_bounds = array<i64: 5, 32, 128>}]} {
    %c0_i32 = arith.constant 0 : i32
    %0 = arith.cmpi eq, %arg1, %c0_i32 : i32
    %1 = arith.extui %0 : i1 to i32
    %c0_i32_0 = arith.constant 0 : i32
    %2 = arith.cmpi ne, %1, %c0_i32_0 : i32
    scf.if %2 {
      %cst_21 = arith.constant 0.000000e+00 : f32
      %38 = vector.broadcast %cst_21 : f32 to vector<32x128xf32>
      %c0_22 = arith.constant 0 : index
      %c0_23 = arith.constant 0 : index
      %39 = vector.load %arg6[%c0_22, %c0_23] : memref<32x128xf32, #tpu.memory_space<vmem>>, vector<32x128xf32>
      tpu.vector_store %arg6[%c0_22, %c0_23], %38 {strides = array<i32>} : memref<32x128xf32, #tpu.memory_space<vmem>>, vector<32x128xf32>,
    } else {
    }
    %c0 = arith.constant 0 : index
    %c0_1 = arith.constant 0 : index
    %3 = vector.load %arg2[%c0, %c0_1] : memref<32x32xf32, #tpu.memory_space<vmem>>, vector<32x32xf32>
    %c0_2 = arith.constant 0 : index
    %c0_3 = arith.constant 0 : index
    %4 = vector.load %arg3[%c0_2, %c0_3] : memref<32x512xf32, #tpu.memory_space<vmem>>, vector<32x512xf32>
    %cst = arith.constant dense<0.000000e+00> : vector<32x512xf32>
    %5 = tpu.matmul %3, %4, %cst {dimension_numbers = #tpu.dot_dimension_numbers<[1], [0], [0], [1], [0, 0, 1, 1], [], []>} : vector<32x32xf32>, vector<32x512xf32>, vector<32x512xf32> -> vector<32x512xf32>
    %c0_4 = arith.constant 0 : index
    %c0_5 = arith.constant 0 : index
    %6 = vector.load %arg4[%c0_4, %c0_5] : memref<1x512xf32, #tpu.memory_space<vmem>>, vector<1x512xf32>
    %7 = vector.broadcast %6 : vector<1x512xf32> to vector<32x512xf32>
    %8 = arith.addf %5, %7 : vector<32x512xf32>
    %c0_6 = arith.constant 0 : index
    %c0_7 = arith.constant 0 : index
    %9 = vector.load %arg6[%c0_6, %c0_7] : memref<32x128xf32, #tpu.memory_space<vmem>>, vector<32x128xf32>
    %10 = vector.extract_strided_slice %8 {offsets = [0, 0], sizes = [32, 128], strides = [1, 1]} : vector<32x512xf32> to vector<32x128xf32>
    %c0_8 = arith.constant 0 : index
    %c0_9 = arith.constant 0 : index
    %c0_10 = arith.constant 0 : index
    %11 = vector.load %arg5[%c0_8, %c0_9, %c0_10] : memref<5x32x128xf32, #tpu.memory_space<vmem>>, vector<1x32x128xf32>
    %12 = vector.shape_cast %11 : vector<1x32x128xf32> to vector<32x128xf32>
    %13 = vector.shape_cast %10 : vector<32x128xf32> to vector<1x32x128xf32>
    tpu.vector_store %arg5[%c0_8, %c0_9, %c0_10], %13 {strides = array<i32>} : memref<5x32x128xf32, #tpu.memory_space<vmem>>, vector<1x32x128xf32>,
    %14 = vector.extract_strided_slice %8 {offsets = [0, 0], sizes = [32, 128], strides = [1, 1]} : vector<32x512xf32> to vector<32x128xf32>
    %15 = arith.addf %9, %14 : vector<32x128xf32>
    %16 = vector.extract_strided_slice %8 {offsets = [0, 128], sizes = [32, 128], strides = [1, 1]} : vector<32x512xf32> to vector<32x128xf32>
    %c1 = arith.constant 1 : index
    %c0_11 = arith.constant 0 : index
    %c0_12 = arith.constant 0 : index
    %17 = vector.load %arg5[%c1, %c0_11, %c0_12] : memref<5x32x128xf32, #tpu.memory_space<vmem>>, vector<1x32x128xf32>
    %18 = vector.shape_cast %17 : vector<1x32x128xf32> to vector<32x128xf32>
    %19 = vector.shape_cast %16 : vector<32x128xf32> to vector<1x32x128xf32>
    tpu.vector_store %arg5[%c1, %c0_11, %c0_12], %19 {strides = array<i32>} : memref<5x32x128xf32, #tpu.memory_space<vmem>>, vector<1x32x128xf32>,
    %20 = vector.extract_strided_slice %8 {offsets = [0, 128], sizes = [32, 128], strides = [1, 1]} : vector<32x512xf32> to vector<32x128xf32>
    %21 = arith.addf %15, %20 : vector<32x128xf32>
    %22 = vector.extract_strided_slice %8 {offsets = [0, 256], sizes = [32, 128], strides = [1, 1]} : vector<32x512xf32> to vector<32x128xf32>
    %c2 = arith.constant 2 : index
    %c0_13 = arith.constant 0 : index
    %c0_14 = arith.constant 0 : index
    %23 = vector.load %arg5[%c2, %c0_13, %c0_14] : memref<5x32x128xf32, #tpu.memory_space<vmem>>, vector<1x32x128xf32>
    %24 = vector.shape_cast %23 : vector<1x32x128xf32> to vector<32x128xf32>
    %25 = vector.shape_cast %22 : vector<32x128xf32> to vector<1x32x128xf32>
    tpu.vector_store %arg5[%c2, %c0_13, %c0_14], %25 {strides = array<i32>} : memref<5x32x128xf32, #tpu.memory_space<vmem>>, vector<1x32x128xf32>,
    %26 = vector.extract_strided_slice %8 {offsets = [0, 256], sizes = [32, 128], strides = [1, 1]} : vector<32x512xf32> to vector<32x128xf32>
    %27 = arith.addf %21, %26 : vector<32x128xf32>
    %28 = vector.extract_strided_slice %8 {offsets = [0, 384], sizes = [32, 128], strides = [1, 1]} : vector<32x512xf32> to vector<32x128xf32>
    %c3 = arith.constant 3 : index
    %c0_15 = arith.constant 0 : index
    %c0_16 = arith.constant 0 : index
    %29 = vector.load %arg5[%c3, %c0_15, %c0_16] : memref<5x32x128xf32, #tpu.memory_space<vmem>>, vector<1x32x128xf32>
    %30 = vector.shape_cast %29 : vector<1x32x128xf32> to vector<32x128xf32>
    %31 = vector.shape_cast %28 : vector<32x128xf32> to vector<1x32x128xf32>
    tpu.vector_store %arg5[%c3, %c0_15, %c0_16], %31 {strides = array<i32>} : memref<5x32x128xf32, #tpu.memory_space<vmem>>, vector<1x32x128xf32>,
    %32 = vector.extract_strided_slice %8 {offsets = [0, 384], sizes = [32, 128], strides = [1, 1]} : vector<32x512xf32> to vector<32x128xf32>
    %33 = arith.addf %27, %32 : vector<32x128xf32>
    %c0_17 = arith.constant 0 : index
    %c0_18 = arith.constant 0 : index
    %34 = vector.load %arg6[%c0_17, %c0_18] : memref<32x128xf32, #tpu.memory_space<vmem>>, vector<32x128xf32>
    tpu.vector_store %arg6[%c0_17, %c0_18], %33 {strides = array<i32>} : memref<32x128xf32, #tpu.memory_space<vmem>>, vector<32x128xf32>,
    %c0_i32_19 = arith.constant 0 : i32
    %35 = arith.cmpi eq, %arg1, %c0_i32_19 : i32
    %36 = arith.extui %35 : i1 to i32
    %c0_i32_20 = arith.constant 0 : i32
    %37 = arith.cmpi ne, %36, %c0_i32_20 : i32
    scf.if %37 {
      %c0_21 = arith.constant 0 : index
      %c0_22 = arith.constant 0 : index
      %38 = vector.load %arg6[%c0_21, %c0_22] : memref<32x128xf32, #tpu.memory_space<vmem>>, vector<32x128xf32>
      %cst_23 = arith.constant 2.500000e-01 : f32
      %39 = vector.broadcast %cst_23 : f32 to vector<32x128xf32>
      %40 = arith.mulf %38, %39 : vector<32x128xf32>
      %c4 = arith.constant 4 : index
      %c0_24 = arith.constant 0 : index
      %c0_25 = arith.constant 0 : index
      %41 = vector.load %arg5[%c4, %c0_24, %c0_25] : memref<5x32x128xf32, #tpu.memory_space<vmem>>, vector<1x32x128xf32>
      %42 = vector.shape_cast %41 : vector<1x32x128xf32> to vector<32x128xf32>
      %43 = vector.shape_cast %40 : vector<32x128xf32> to vector<1x32x128xf32>
      tpu.vector_store %arg5[%c4, %c0_24, %c0_25], %43 {strides = array<i32>} : memref<5x32x128xf32, #tpu.memory_space<vmem>>, vector<1x32x128xf32>,
    } else {
    }
    return
  }
  func.func @transform_0(%arg0: i32, %arg1: i32) -> (i32, i32) {
    %c0_i32 = arith.constant 0 : i32
    %c0_i32_0 = arith.constant 0 : i32
    return %arg0, %c0_i32 : i32, i32
  }
  func.func @transform_1(%arg0: i32, %arg1: i32) -> (i32, i32) {
    %c0_i32 = arith.constant 0 : i32
    %c0_i32_0 = arith.constant 0 : i32
    return %c0_i32, %arg1 : i32, i32
  }
  func.func @transform_2(%arg0: i32, %arg1: i32) -> (i32, i32) {
    %c0_i32 = arith.constant 0 : i32
    %c0_i32_0 = arith.constant 0 : i32
    return %c0_i32, %arg1 : i32, i32
  }
  func.func @transform_3(%arg0: i32, %arg1: i32) -> (i32, i32, i32) {
    %c0_i32 = arith.constant 0 : i32
    %c0_i32_0 = arith.constant 0 : i32
    %c0_i32_1 = arith.constant 0 : i32
    return %c0_i32, %arg0, %c0_i32_0 : i32, i32, i32
  }
}

</mosaic_0001>

<bundles_post_ra>
// kernel: ensemble_forward.1
= control target key start
LH: loop header
LB: loop body
LE: loop exit
PB: predicated region body
PF: predicated region fallthrough
CT: control target
= control target key end

     0   :  { %8 = vsyncpa [#allocation4], 0  ;;  %s1098_s0 = inlined_call_operand.vmem [shape: f32[64,32], index: 0, kind: input, shape index: {}]   ;;  %s1099_s1 = inlined_call_operand.hbm [shape: f32[32,512], index: 1, kind: input, shape index: {}]   ;;  %s1100_s2 = inlined_call_operand.vmem [shape: f32[1,512], index: 2, kind: input, shape index: {}]   ;;  %s1101_s3 = inlined_call_operand.hbm [shape: f32[5,64,128], index: 3, kind: output, shape index: {}]  }
   0x1   :  { %9 = vsyncpa [#allocation5], 0 }
   0x2   :  { %11 = vsyncpa [#allocation5 + $0x1], 0  ;;  %s919_s12 = smov 0   ;;  %s921_s13 = smov 0  }
   0x3   :  { %s923_s14 = smov 0   ;;  %s925_s15 = smov 0  }
   0x4   :  { %s927_s16 = smov 0   ;;  %s929_s17 = smov 0  }
   0x5 LB: > { %s666_s18 = sadd.s32 4294967295, %s886_s17   ;;  %s667_s19 = sadd.s32 4294967294, %s886_s17   ;;  %s886_s17 = sphi %s929_s17, %s17_s17   ;;  %s882_s16 = sphi %s927_s16, %s1119_s16   ;;  %s878_s15 = sphi %s925_s15, %s1118_s15   ;;  %s874_s14 = sphi %s923_s14, %s1117_s14   ;;  %s870_s13 = sphi %s921_s13, %s1116_s13   ;;  %s866_s12 = sphi %s919_s12, %s1115_s12  }
   0x6   : > { %s29_s20 = sadd.s32 1, %s882_s16  ;;  %s114_s21 = sadd.s32 1, %s874_s14 }
   0x7   : > { %p31_p0 = scmp.ge.s32.totalorder %s29_s20, 2  ;;  %p124_p1 = scmp.ne.s32.totalorder %s874_s14, %s870_s13 }
   0x8   : > { %p125_p2 = scmp.eq.s32.totalorder %s666_s18, 1  ;;  %p130_p3 = scmp.ne.s32.totalorder %s870_s13, %s866_s12 }
   0x9   : > { %s1121_s20 = smov (%p31_p0, %s29_s20), 0  ;;  %p131_p5 = scmp.eq.s32.totalorder %s667_s19, 1 }
   0xa   : > { %p959_p4 = por %p125_p2, %p124_p1  ;;  %s111_s23 = ssub.s32 %s882_s16, %s1121_s20 }
   0xb   : > { %p668_p6 = scmp.ge.s32.totalorder %s886_s17, 1  ;;  %p112_p7 = scmp.eq.s32.totalorder %s111_s23, 0 }
   0xc   : > { %s1106_s22 = scalar_select %p959_p4, 1, 0 }
   0xd   : > { %p966_p8 = por %p131_p5, %p130_p3  ;;  %p138_p9 = scmp.lt.s32.totalorder %s886_s17, 3 }
   0xe   : > { %s972_s25 = scalar_select %p112_p7, %s874_s14, %s114_s21  }
   0xf   : > { %s1107_s24 = scalar_select %p966_p8, 1, 0 }
  0x10   : > { %p974_p10 = pnand %p668_p6, %p138_p9  ;;  %p978_p11 = scmp.eq.s32.totalorder %s666_s18, 0 }
  0x11   : > { %s888_s28 = smov [#allocation3]   ;;  %s804_s6 = scalar_lea.hbm %s1099_s1, 2048 }
  0x12   : > { %s1108_s26 = scalar_select %p974_p10, 1, 0 }
  0x13   : > { %s1109_s27 = scalar_select %p978_p11, 1, 0 }
  0x14   : > { %p734_p12 = pneg %p974_p10  ;;  %s153_s29 = sshll.u32 %s888_s28, 4  ;;  %s154_s29 = int_to_ptr.vmem [resolvable:$true] %s153_s29 }
  0x15   : > { %p805_p0 = scmp.ne.s32.totalorder %s1099_s1, %s804_s6  ;;  %p811_p5 = scmp.lt.u32.totalorder %s804_s6, %s1099_s1 }
  0x16   : > { %p986_p13 = pnand %p978_p11, %p734_p12 }
  0x18   : > { %p806_p1 = pneg %p986_p13 }
  0x1a   : > { %p807_p2 = pnand %p806_p1, %p805_p0 }
  0x1c   : > { %p808_p3 = pneg %p807_p2 }
  0x1e   : > { %p813_p6 = pnand %p811_p5, %p808_p3 }
  0x20   : > { %816 = shalt.err (!%p813_p6)
}
  0x21   : > { %s817_s11 = scalar_lea.vmem %s154_s29, 2048  ;;  %p825_p8 = scmp.lt.s32.totalorder %s154_s29, %s154_s29 }
  0x22   : > { %p818_p7 = scmp.ne.s32.totalorder %s154_s29, %s817_s11  ;;  %p826_p4 = scmp.lt.s32.totalorder %s817_s11, %s817_s11 }
  0x24   : > { %p820_p9 = pnand %p818_p7, %p806_p1  ;;  %p827_p11 = por %p826_p4, %p825_p8 }
  0x26   : > { %p821_p12 = pneg %p820_p9 }
  0x28   : > { %p828_p10 = pnand %p827_p11, %p821_p12 }
  0x2a   : > { %831 = shalt.err (!%p828_p10)
}
  0x2b   : > { %s889_s18 = smov 512   ;;  %s890_s19 = smov 32  }
  0x2c   : > { %737 = dma.hbm_to_vmem [thread:$0]  (!%p986_p13), %s1099_s1, 2048, %s154_s29, [#allocation4], %s889_s18, %s889_s18, %s890_s19  }
  0x2d   : > { %p1111_p0 = scmp.ne.s32.totalorder %s1108_s26, 0 }
  0x2e   : > { %p1112_p2 = scmp.ne.s32.totalorder (!%p1111_p0), %s1109_s27, 0 }
  0x2f   : > { %186 = sbr.rel (%p1111_p0) target bundleno = 314 (0x13a), region = 32 }
  0x36   : > { %857 = dma.done.wait (%p1112_p2), [#allocation4], 2048  }
  0x37   : > { %859 = vsyncadd (%p1112_p2), [#allocation4], 4294965248  ;;  %s674_s28 = sshll.u32 %s878_s15, 2  ;;  %v891_v0 = vmov 0.0   ;;  %v240_v1 = vld [vmem:[#allocation3 + $0x8] sm:$0xff]  ;;  %v239_v3 = vld [vmem:[#allocation3] sm:$0xff]  ;;  %v257_v29 = vlaneseq }
  0x38   : > { %354 = vmatprep.mubr.f32.mxu0 %v891_v0  ;;  %p215_p4 = scmp.lt.s32.totalorder %s674_s28, 7  ;;  %443 = vmatprep.mubr.f32.mxu1 %v891_v0  ;;  %v244_v2 = vld [vmem:[#allocation3 + $0x28] sm:$0xff]  ;;  %v243_v5 = vld [vmem:[#allocation3 + $0x20] sm:$0xff]  ;;  %v242_v6 = vld [vmem:[#allocation3 + $0x18] sm:$0xff]  ;;  %vm277_vm0 = vcmask 261120   ;;  %s211_s4 = sand.u32 1, %s870_s13  }
  0x39   : > { %v705_v4 = vpack.c.bf16 %v244_v2, %v240_v1  ;;  %v246_v7 = vld [vmem:[#allocation3 + $0x38] sm:$0xff]  ;;  %v707_v8 = vpack.c.bf16 %v243_v5, %v239_v3  ;;  %v241_v10 = vld [vmem:[#allocation3 + $0x10] sm:$0xff]  ;;  %v248_v12 = vld [vmem:[#allocation3 + $0x48] sm:$0xff]  ;;  %v258_v30 = vshrl.u32 %v257_v29, 7  ;;  %s721_s7 = smul.u32 160, %s211_s4  ;;  %s528_s9 = scalar_lea.sflag [#allocation5], %s211_s4 }
  0x3a   : > { %s1123_s28 = smov (!%p215_p4, %s674_s28), 7  ;;  %v713_v9 = vpack.c.bf16 %v246_v7, %v242_v6  ;;  %v245_v11 = vld [vmem:[#allocation3 + $0x30] sm:$0xff]  ;;  %v252_v14 = vld [vmem:[#allocation3 + $0x68] sm:$0xff]  ;;  %v247_v15 = vld [vmem:[#allocation3 + $0x40] sm:$0xff] }
  0x3b   : > { %s675_s26 = sshll.u32 %s1123_s28, 3  ;;  %706 = vmatprep.subr.bf16.mxu0 %v705_v4  ;;  %v715_v13 = vpack.c.bf16 %v245_v11, %v241_v10  ;;  %v251_v16 = vld [vmem:[#allocation3 + $0x60] sm:$0xff]  ;;  %v709_v17 = vpack.c.bf16 %v252_v14, %v248_v12  ;;  %v250_v19 = vld [vmem:[#allocation3 + $0x58] sm:$0xff]  ;;  %v249_v21 = vld [vmem:[#allocation3 + $0x50] sm:$0xff]  ;;  %v259_v31 = vsub.s32 0, %v258_v30  ;;  %v263_v33 = vsub.s32 1, %v258_v30 }
  0x3c   : > { %708 = vmatpush1.bf16.msra.mxu0 %v707_v8  ;;  %714 = vmatprep.subr.bf16.mxu1 %v713_v9  ;;  %v711_v18 = vpack.c.bf16 %v251_v16, %v247_v15  ;;  %v254_v20 = vld [vmem:[#allocation3 + $0x78] sm:$0xff]  ;;  %v253_v23 = vld [vmem:[#allocation3 + $0x70] sm:$0xff]  ;;  %s218_s30 = scalar_lea.vmem %s1098_s0, %s675_s26  ;;  %v255_v32 = vld [vmem:[%s1100_s2] sm:$0xf]  ;;  %v267_v34 = vsub.s32 2, %v258_v30  ;;  %v271_v35 = vsub.s32 3, %v258_v30 }
  0x3d   : > { %716 = vmatpush1.bf16.msra.mxu1 %v715_v13  ;;  %v717_v22 = vpack.c.bf16 %v254_v20, %v250_v19  ;;  %710 = vmatprep.subr.bf16.mxu0 %v709_v17  ;;  %v719_v24 = vpack.c.bf16 %v253_v23, %v249_v21  ;;  %v235_v25 = vld [vmem:[%s218_s30] sm:$0xff]  ;;  %v236_v26 = vld [vmem:[%s218_s30 + $0x8] sm:$0xff]  ;;  %v237_v27 = vld [vmem:[%s218_s30 + $0x10] sm:$0xff]  ;;  %v260_v36 = vrot.slane %v255_v32, %v259_v31  ;;  %s1033_s8 = scalar_lea.vmem [#allocation6], %s721_s7 }
  0x3e   : > { %v238_v28 = vld [vmem:[%s218_s30 + $0x18] sm:$0xff]  ;;  %v264_v37 = vrot.slane %v255_v32, %v263_v33  ;;  %v268_v38 = vrot.slane %v255_v32, %v267_v34  ;;  %v272_v39 = vrot.slane %v255_v32, %v271_v35 }
  0x3f   : > { %718 = vmatprep.subr.bf16.mxu1 %v717_v22 }
  0x40   : > { %712 = vmatpush1.bf16.msra.mxu0 %v711_v18 }
  0x41   : > { %720 = vmatpush1.bf16.msra.mxu1 %v719_v24 }
  0x43   : > { %676 = vmatmul.mubr.msk.f32.vlgmr.msra.gmra.mrb[0].mxu0 %vm277_vm0, %v235_v25 }
  0x44   : > { %680 = vmatmul.mubr.msk.f32.vlgmr.msra.gmra.mrb[0].mxu1 %vm277_vm0, %v235_v25  ;;  %360 = vmatprep.mubr.f32.mxu0 %v891_v0 }
  0x45   : > { %449 = vmatprep.mubr.f32.mxu1 %v891_v0 }
  0x47   : > { %677 = vmatmul.mubr.msk.f32.gmra.mrb[2].mxu0 %vm277_vm0, %v236_v26 }
  0x48   : > { %681 = vmatmul.mubr.msk.f32.gmra.mrb[2].mxu1 %vm277_vm0, %v236_v26  ;;  %366 = vmatprep.mubr.f32.mxu0 %v891_v0 }
  0x49   : > { %455 = vmatprep.mubr.f32.mxu1 %v891_v0 }
  0x4b   : > { %678 = vmatmul.mubr.msk.f32.gmra.mrb[4].mxu0 %vm277_vm0, %v237_v27 }
  0x4c   : > { %682 = vmatmul.mubr.msk.f32.gmra.mrb[4].mxu1 %vm277_vm0, %v237_v27  ;;  %372 = vmatprep.mubr.f32.mxu0 %v891_v0 }
  0x4d   : > { %461 = vmatprep.mubr.f32.mxu1 %v891_v0 }
  0x4f   : > { %679 = vmatmul.mubr.msk.f32.gmra.mrb[6].mxu0 %vm277_vm0, %v238_v28 }
  0x50   : > { %683 = vmatmul.mubr.msk.f32.gmra.mrb[6].mxu1 %vm277_vm0, %v238_v28 }
 0x116   : > { %v356_v40 = vpop.f32.mrb[0].mxu0 }
 0x117   : > { %v357_v41 = vadd.f32 %v356_v40, %v260_v36  ;;  %v358_v42 = vpop.f32.mrb[1].mxu0  ;;  %v445_v43 = vpop.f32.mrb[0].mxu1 }
 0x118   : > { %v359_v44 = vadd.f32 %v358_v42, %v264_v37  ;;  %v446_v45 = vadd.f32 %v445_v43, %v268_v38  ;;  %v447_v46 = vpop.f32.mrb[1].mxu1 }
 0x119   : > { %472 = vst [vmem:[%s1033_s8] sm:$0xff] %v357_v41  ;;  %v448_v47 = vadd.f32 %v447_v46, %v272_v39 }
 0x11a   : > { %684 = vst [vmem:[%s1033_s8 + $0x20] sm:$0xff] %v359_v44  ;;  %v485_v48 = vadd.f32 %v359_v44, %v357_v41  ;;  %688 = vst [vmem:[%s1033_s8 + $0x40] sm:$0xff] %v446_v45  ;;  %v362_v49 = vpop.f32.mrb[2].mxu0 }
 0x11b   : > { %692 = vst [vmem:[%s1033_s8 + $0x60] sm:$0xff] %v448_v47  ;;  %v363_v50 = vadd.f32 %v362_v49, %v260_v36  ;;  %v364_v51 = vpop.f32.mrb[3].mxu0  ;;  %v451_v52 = vpop.f32.mrb[2].mxu1 }
 0x11c   : > { %v494_v53 = vadd.f32 %v485_v48, %v446_v45  ;;  %v365_v54 = vadd.f32 %v364_v51, %v264_v37  ;;  %v452_v55 = vadd.f32 %v451_v52, %v268_v38  ;;  %v453_v56 = vpop.f32.mrb[3].mxu1 }
 0x11d   : > { %473 = vst [vmem:[%s1033_s8 + $0x8] sm:$0xff] %v363_v50  ;;  %v454_v57 = vadd.f32 %v453_v56, %v272_v39 }
 0x11e   : > { %v503_v58 = vadd.f32 %v494_v53, %v448_v47  ;;  %685 = vst [vmem:[%s1033_s8 + $0x28] sm:$0xff] %v365_v54  ;;  %v486_v59 = vadd.f32 %v365_v54, %v363_v50  ;;  %689 = vst [vmem:[%s1033_s8 + $0x48] sm:$0xff] %v452_v55  ;;  %v368_v60 = vpop.f32.mrb[4].mxu0 }
 0x11f   : > { %693 = vst [vmem:[%s1033_s8 + $0x68] sm:$0xff] %v454_v57  ;;  %v369_v61 = vadd.f32 %v368_v60, %v260_v36  ;;  %v370_v62 = vpop.f32.mrb[5].mxu0  ;;  %v457_v63 = vpop.f32.mrb[4].mxu1 }
 0x120   : > { %v518_v0 = vmul.f32 0.25, %v503_v58  ;;  %v495_v1 = vadd.f32 %v486_v59, %v452_v55  ;;  %v371_v2 = vadd.f32 %v370_v62, %v264_v37  ;;  %v458_v3 = vadd.f32 %v457_v63, %v268_v38  ;;  %v459_v4 = vpop.f32.mrb[5].mxu1 }
 0x121   : > { %474 = vst [vmem:[%s1033_s8 + $0x10] sm:$0xff] %v369_v61  ;;  %v460_v5 = vadd.f32 %v459_v4, %v272_v39 }
 0x122   : > { %696 = vst [vmem:[%s1033_s8 + $0x80] sm:$0xff] %v518_v0  ;;  %v504_v6 = vadd.f32 %v495_v1, %v454_v57  ;;  %686 = vst [vmem:[%s1033_s8 + $0x30] sm:$0xff] %v371_v2  ;;  %v487_v7 = vadd.f32 %v371_v2, %v369_v61  ;;  %v374_v8 = vpop.f32.mrb[6].mxu0 }
 0x123   : > { %690 = vst [vmem:[%s1033_s8 + $0x50] sm:$0xff] %v458_v3  ;;  %694 = vst [vmem:[%s1033_s8 + $0x70] sm:$0xff] %v460_v5  ;;  %v375_v9 = vadd.f32 %v374_v8, %v260_v36  ;;  %v376_v10 = vpop.f32.mrb[7].mxu0  ;;  %v463_v11 = vpop.f32.mrb[6].mxu1 }
 0x124   : > { %v519_v12 = vmul.f32 0.25, %v504_v6  ;;  %v496_v13 = vadd.f32 %v487_v7, %v458_v3  ;;  %v377_v14 = vadd.f32 %v376_v10, %v264_v37  ;;  %v464_v15 = vadd.f32 %v463_v11, %v268_v38  ;;  %v465_v16 = vpop.f32.mrb[7].mxu1 }
 0x125   : > { %475 = vst [vmem:[%s1033_s8 + $0x18] sm:$0xff] %v375_v9  ;;  %v466_v17 = vadd.f32 %v465_v16, %v272_v39 }
 0x126   : > { %697 = vst [vmem:[%s1033_s8 + $0x88] sm:$0xff] %v519_v12  ;;  %v505_v18 = vadd.f32 %v496_v13, %v460_v5  ;;  %687 = vst [vmem:[%s1033_s8 + $0x38] sm:$0xff] %v377_v14  ;;  %v488_v19 = vadd.f32 %v377_v14, %v375_v9 }
 0x127   : > { %691 = vst [vmem:[%s1033_s8 + $0x58] sm:$0xff] %v464_v15  ;;  %695 = vst [vmem:[%s1033_s8 + $0x78] sm:$0xff] %v466_v17 }
 0x128   : > { %v520_v20 = vmul.f32 0.25, %v505_v18  ;;  %v497_v21 = vadd.f32 %v488_v19, %v464_v15 }
 0x12a   : > { %698 = vst [vmem:[%s1033_s8 + $0x90] sm:$0xff] %v520_v20  ;;  %v506_v22 = vadd.f32 %v497_v21, %v466_v17 }
 0x12c   : > { %v521_v23 = vmul.f32 0.25, %v506_v22 }
 0x12e   : > { %699 = vst [vmem:[%s1033_s8 + $0x98] sm:$0xff] %v521_v23 }
 0x12f   : > { %s704_s10 = sshll.u32 %s878_s15, 9  ;;  %s557_s11 = sshll.u32 %s1033_s8, 4  ;;  %s558_s11 = int_to_ptr.vmem [resolvable:$true] %s557_s11 }
 0x130   : > { %s540_s21 = scalar_lea.hbm %s1101_s3, %s704_s10  ;;  %s892_s23 = smov 512  }
 0x131   : > { %p1113_p8 = scmp.ne.s32.totalorder %s1106_s22, 0  ;;  %s893_s28 = smov 1024  }
 0x132   : > { %s894_s26 = smov 4   ;;  %s895_s27 = smov 128  }
 0x133   : > { %726 = sst [smem:[#allocation8]] (%p1113_p8), %s892_s23  ;;  %s896_s15 = smov 8  }
 0x134   : > { %727 = sst [smem:[#allocation8 + $0x1]] (%p1113_p8), %s893_s28  ;;  %s897_s29 = smov [#allocation7]  }
 0x135   : > { %728 = sst [smem:[#allocation8 + $0x2]] (%p1113_p8), %s894_s26  ;;  %s898_s30 = smov 0  }
 0x136   : > { %729 = sst [smem:[#allocation8 + $0x3]] (%p1113_p8), %s895_s27 }
 0x137   : > { %730 = sst [smem:[#allocation8 + $0x4]] (%p1113_p8), %s895_s27 }
 0x138   : > { %731 = sst [smem:[#allocation8 + $0x5]] (%p1113_p8), %s896_s15 }
 0x139   : > { %732 = dma.general (%p1113_p8), %s558_s11, 2560, %s540_s21, %s528_s9, %s897_s29, [#allocation8], %s898_s30, 0  }
 0x13a PF: > { %p744_p10 = scmp.ge.s32.totalorder %s886_s17, 2  ;;  %s585_s4 = sand.u32 1, %s866_s12  }
 0x13b   : > { %p1114_p11 = scmp.ne.s32.totalorder %s1107_s24, 0  ;;  %s586_s5 = scalar_lea.sflag [#allocation5], %s585_s4 }
 0x13d   : > { %p739_p13 = pnand %p744_p10, %p1114_p11 }
 0x13f   : > { %861 = dma.done.wait (!%p739_p13), %s586_s5, 2560  }
 0x140   : > { %863 = vsyncadd (!%p739_p13), %s586_s5, 4294964736  ;;  %s17_s17 = sadd.s32 1, %s886_s17   ;;  %s1115_s12 = smov %s870_s13 }
 0x141   : > { %p14_p1 = scmp.ge.s32.totalorder %s17_s17, 4   ;;  %s1116_s13 = smov %s874_s14 }
 0x142   : > { %s1117_s14 = smov %s972_s25  ;;  %s1118_s15 = smov %s882_s16 }
 0x143   : > { %s1119_s16 = smov %s1121_s20  ;;  %16 = sbr.rel (!%p14_p1) target bundleno = 5 (0x5), region = 93 }
 0x14a   :  { %591 = vsyncpa [#allocation4], 1 }
 0x14b   :  { %593 = vsyncpa [#allocation4 + $0x1], 1 }
 0x14c   :  { %594 = vsyncpa [#allocation5], 1 }
 0x14d   :  { %596 = vsyncpa [#allocation5 + $0x1], 1 }

</bundles_post_ra>
